<compile_context>
chip_gen: v5e
topology: v5e:2x2
jax: 0.10.0
libtpu: 0.0.40
codegen_flags: <defaults>
</compile_context>

<pallas_src>
import math

import jax
import jax.numpy as jnp
import numpy as np
from jax.experimental import pallas as pl
from jax.experimental.pallas import tpu as pltpu


def _round_up(x, m):
    return ((x + m - 1) // m) * m


def _gelu_exact(x):
    # PyTorch nn.GELU() default = exact erf-based GELU.
    return 0.5 * x * (1.0 + jax.lax.erf(x * (1.0 / math.sqrt(2.0))))


def _make_kernel(s_cols, c_cols, hid_cols, out_cols, offs):
    off_w0s, off_w0c, off_b0, off_w1, off_b1 = offs

    def body(s_ref, c_ref, p_ref, o_ref):
        # Layer 0, split-weight form (no lane concat of [s, conditioning]).
        w0s = p_ref[off_w0s:off_w0s + s_cols, 0:hid_cols]
        h = jnp.dot(s_ref[...], w0s, preferred_element_type=jnp.float32)
        if c_cols > 0:
            w0c = p_ref[off_w0c:off_w0c + c_cols, 0:hid_cols]
            h = h + jnp.dot(c_ref[...], w0c, preferred_element_type=jnp.float32)
        h = h + p_ref[off_b0:off_b0 + 1, 0:hid_cols]
        h = _gelu_exact(h)
        # Output layer (lane-dense: out_cols = 2 * s_emb).
        w1 = p_ref[off_w1:off_w1 + hid_cols, 0:out_cols]
        out = jnp.dot(h, w1, preferred_element_type=jnp.float32)
        out = out + p_ref[off_b1:off_b1 + 1, 0:out_cols]
        # TODO(synk): scalarMLP's non-default options (dropout>0, norm) are not
        # implemented; the module defaults (dropout=0, norm=None) are identity.
        o_ref[...] = out.astype(o_ref.dtype)

    if c_cols > 0:
        def kernel(s_ref, c_ref, p_ref, o_ref):
            body(s_ref, c_ref, p_ref, o_ref)
    else:
        def kernel(s_ref, p_ref, o_ref):
            body(s_ref, None, p_ref, o_ref)
    return kernel


def pack_params(p, s_dim, cond_dim):
    """Pack pair-blocked weights into ONE lane-aligned f32 buffer (single DMA).

    Batch rows are processed in pairs (the wrapper views [B, d] as [B//2, 2d]),
    so every weight W becomes blockdiag(W, W) and every bias b becomes
    concat(b, b).  This makes the kernel's output tile 2*s_emb (=128 for the
    default s_emb=64) lanes wide -> unmasked lane-dense stores.
    """
    w0 = np.asarray(p["w0"], np.float32)   # [s_dim + cond_dim, hidden]
    b0 = np.asarray(p["b0"], np.float32)   # [hidden]
    w1 = np.asarray(p["w1"], np.float32)   # [hidden, s_emb]
    b1 = np.asarray(p["b1"], np.float32)   # [s_emb]
    hidden, s_emb = w0.shape[1], w1.shape[1]

    def blockdiag2(w):
        fi, fo = w.shape
        out = np.zeros((2 * fi, 2 * fo), np.float32)
        out[:fi, :fo] = w
        out[fi:, fo:] = w
        return out

    s_cols, c_cols = 2 * s_dim, 2 * cond_dim
    hid_cols, out_cols = 2 * hidden, 2 * s_emb

    C = _round_up(max(hid_cols, out_cols), 128)      # lane-aligned buffer width
    off_w0s = 0
    off_w0c = _round_up(s_cols, 8)
    off_b0 = off_w0c + (_round_up(c_cols, 8) if cond_dim > 0 else 0)
    off_w1 = off_b0 + 8
    off_b1 = off_w1 + _round_up(hid_cols, 8)
    R_total = off_b1 + 8

    buf = np.zeros((R_total, C), np.float32)
    buf[off_w0s:off_w0s + s_cols, :hid_cols] = blockdiag2(w0[:s_dim])
    if cond_dim > 0:
        buf[off_w0c:off_w0c + c_cols, :hid_cols] = blockdiag2(w0[s_dim:])
    buf[off_b0, :hid_cols] = np.concatenate([b0, b0])
    buf[off_w1:off_w1 + hid_cols, :out_cols] = blockdiag2(w1)
    buf[off_b1, :out_cols] = np.concatenate([b1, b1])

    return dict(packed=jnp.asarray(buf),
                offsets=(off_w0s, off_w0c, off_b0, off_w1, off_b1),
                s_dim=s_dim, cond_dim=cond_dim, hidden=hidden, s_emb=s_emb)


def state_encoding_forward(s, params, conditioning=None, *, block_b=1024):
    """s: [B, s_dim] f32. params: output of pack_params. conditioning: [B, cond_dim] or None."""
    s = jnp.asarray(s, jnp.float32)
    B, s_dim = s.shape
    assert s_dim == params["s_dim"]
    cond_dim = params["cond_dim"]
    if cond_dim > 0:
        assert conditioning is not None and conditioning.shape == (B, cond_dim)
        conditioning = jnp.asarray(conditioning, jnp.float32)
    else:
        assert conditioning is None
    hidden, s_emb = params["hidden"], params["s_emb"]
    packed = params["packed"]
    s_cols, c_cols = 2 * s_dim, 2 * cond_dim
    hid_cols, out_cols = 2 * hidden, 2 * s_emb

    # Pair-pack rows: [B, d] -> [B/2, 2d] is a contiguous (free) view; only odd
    # or tiny batches get padded, so the hot path has no pad/slice HBM round trips.
    B_pad = B + (B % 2)
    if B_pad < 16:
        B_pad = 16
    if B_pad != B:
        s = jnp.pad(s, ((0, B_pad - B), (0, 0)))
        if cond_dim > 0:
            conditioning = jnp.pad(conditioning, ((0, B_pad - B), (0, 0)))
    B2 = B_pad // 2
    s2 = s.reshape(B2, s_cols)
    c2 = conditioning.reshape(B2, c_cols) if cond_dim > 0 else None

    # Batch tile (in pair-rows): large to amortize per-step overhead and weight
    # reuse; >=2 grid steps when possible (v7x megacore); clamped by a VMEM budget
    # that is safe on every generation (tightest: v7x's 64 MiB per TC).
    packed_bytes = int(packed.size) * 4
    per_row_bytes = 4 * (2 * (s_cols + c_cols + out_cols) + 4 * hid_cols)
    vmem_budget = 40 * 1024 * 1024
    cap_rows = max(8, ((vmem_budget - 2 * packed_bytes) // per_row_bytes) // 8 * 8)
    bt2 = max(8, (min(block_b // 2, B2) // 8) * 8)
    if B2 >= 16:
        bt2 = min(bt2, _round_up(pl.cdiv(B2, 2), 8))   # keep both TCs busy on v7x
    bt2 = min(bt2, cap_rows)
    grid = (pl.cdiv(B2, bt2),)                         # ragged last block handled by Pallas

    kernel = _make_kernel(s_cols, c_cols, hid_cols, out_cols, params["offsets"])

    in_specs = [pl.BlockSpec((bt2, s_cols), lambda i: (i, 0))]
    args = [s2]
    if cond_dim > 0:
        in_specs.append(pl.BlockSpec((bt2, c_cols), lambda i: (i, 0)))
        args.append(c2)
    # Single packed parameter buffer; constant index_map -> one DMA, VMEM-resident.
    in_specs.append(pl.BlockSpec(packed.shape, lambda i: (0, 0)))
    args.append(packed)

    # Only raise the scoped VMEM limit when the working set actually needs it.
    est_vmem = (2 * bt2 * 4 * (s_cols + c_cols + out_cols)
                + 4 * bt2 * 4 * hid_cols + 2 * packed_bytes)
    cp_kwargs = dict(dimension_semantics=("parallel",))
    if est_vmem > 12 * 1024 * 1024:
        cp_kwargs["vmem_limit_bytes"] = int(min(max(est_vmem * 3 // 2, 16 * 1024 * 1024),
                                                48 * 1024 * 1024))

    cost = pl.CostEstimate(
        flops=2 * B * (s_dim + cond_dim) * hidden + 2 * B * hidden * s_emb,
        transcendentals=B * hidden,
        bytes_accessed=4 * (B * (s_dim + cond_dim) + int(packed.size) + B * s_emb),
    )

    out2 = pl.pallas_call(
        kernel,
        out_shape=jax.ShapeDtypeStruct((B2, out_cols), jnp.float32),
        grid=grid,
        in_specs=in_specs,
        out_specs=pl.BlockSpec((bt2, out_cols), lambda i: (i, 0)),
        compiler_params=pltpu.CompilerParams(**cp_kwargs),
        cost_estimate=cost,
    )(*args)

    out = out2.reshape(B_pad, s_emb)       # free contiguous view back to per-row layout
    return out[:B] if B_pad != B else out


def init_params(key, s_dim, cond_dim, hidden_dim, s_emb_dim):
    """Deterministic synthetic init mirroring the PyTorch module's Linear shapes
    (weights stored pre-transposed as [in, out])."""
    in_dim = s_dim + cond_dim
    k0, k1, k2, k3 = jax.random.split(key, 4)

    def linear(kw, kb, fan_in, fan_out):
        bound = 1.0 / math.sqrt(fan_in)
        w = jax.random.uniform(kw, (fan_in, fan_out), jnp.float32, -bound, bound)
        b = jax.random.uniform(kb, (fan_out,), jnp.float32, -bound, bound)
        return w, b

    w0, b0 = linear(k0, k1, in_dim, hidden_dim)
    w1, b1 = linear(k2, k3, hidden_dim, s_emb_dim)
    return dict(w0=w0, b0=b0, w1=w1, b1=b1)


def reference_forward(s, p, conditioning=None):
    x = s if conditioning is None else jnp.concatenate([s, conditioning], axis=-1)
    h = _gelu_exact(x @ p["w0"] + p["b0"])
    return h @ p["w1"] + p["b1"]


if __name__ == "__main__":
    s_dim, cond_dim, hidden_dim, s_emb_dim = 32, 16, 64, 64
    key = jax.random.PRNGKey(0)
    k_p1, k_p2, k_s1, k_c1, k_s2, k_s3 = jax.random.split(key, 6)

    # Case 1: with conditioning, batch=16 (single tile, split-w0 + pair-packed path).
    raw1 = init_params(k_p1, s_dim, cond_dim, hidden_dim, s_emb_dim)
    prm1 = pack_params(raw1, s_dim, cond_dim)
    s1 = jax.random.normal(k_s1, (16, s_dim), jnp.float32)
    c1 = jax.random.normal(k_c1, (16, cond_dim), jnp.float32)
    out1 = jax.block_until_ready(state_encoding_forward(s1, prm1, c1))
    ref1 = reference_forward(s1, raw1, c1)
    assert out1.shape == (16, s_emb_dim)
    assert np.allclose(np.asarray(out1), np.asarray(ref1), rtol=1e-5, atol=1e-5)

    # Case 2: no conditioning, batch=20 -> 10 pair-rows over 8-row tiles (ragged last block).
    raw2 = init_params(k_p2, s_dim, 0, hidden_dim, s_emb_dim)
    prm2 = pack_params(raw2, s_dim, 0)
    s2 = jax.random.normal(k_s2, (20, s_dim), jnp.float32)
    out2 = jax.block_until_ready(state_encoding_forward(s2, prm2, None))
    ref2 = reference_forward(s2, raw2, None)
    assert out2.shape == (20, s_emb_dim)
    assert np.allclose(np.asarray(out2), np.asarray(ref2), rtol=1e-5, atol=1e-5)

    # Case 3: odd batch (101) with block_b=64 -> pad-to-even path, multi-step
    # "parallel" grid with a partial trailing block.
    s3 = jax.random.normal(k_s3, (101, s_dim), jnp.float32)
    out3 = jax.block_until_ready(state_encoding_forward(s3, prm2, None, block_b=64))
    ref3 = reference_forward(s3, raw2, None)
    assert out3.shape == (101, s_emb_dim)
    assert np.allclose(np.asarray(out3), np.asarray(ref3), rtol=1e-5, atol=1e-5)

    print("KERNEL_OK")
</pallas_src>

<mosaic_0001>
module attributes {stable_mosaic.version = 11 : i64} {
  func.func @kernel(%arg0: i32, %arg1: memref<8x64xf32, #tpu.memory_space<vmem>>, %arg2: memref<8x32xf32, #tpu.memory_space<vmem>>, %arg3: memref<240x128xf32, #tpu.memory_space<vmem>>, %arg4: memref<8x128xf32, #tpu.memory_space<vmem>>) attributes {dimension_semantics = [#tpu.dimension_semantics<parallel>], iteration_bounds = array<i64: 1>, scalar_prefetch = 0 : i64, scratch_operands = 0 : i64, tpu.core_type = #tpu.core_type<tc>, window_params = [{transform_indices = @transform_0, window_bounds = array<i64: 8, 64>}, {transform_indices = @transform_1, window_bounds = array<i64: 8, 32>}, {pipeline_mode = #tpu.pipeline_mode<synchronous>, transform_indices = @transform_2, window_bounds = array<i64: 240, 128>}, {transform_indices = @transform_3, window_bounds = array<i64: 8, 128>}]} {
    %c0 = arith.constant 0 : index
    %c0_0 = arith.constant 0 : index
    %0 = vector.load %arg3[%c0, %c0_0] : memref<240x128xf32, #tpu.memory_space<vmem>>, vector<64x128xf32>
    %c0_1 = arith.constant 0 : index
    %c0_2 = arith.constant 0 : index
    %1 = vector.load %arg1[%c0_1, %c0_2] : memref<8x64xf32, #tpu.memory_space<vmem>>, vector<8x64xf32>
    %cst = arith.constant dense<0.000000e+00> : vector<8x128xf32>
    %2 = tpu.matmul %1, %0, %cst {dimension_numbers = #tpu.dot_dimension_numbers<[1], [0], [0], [1], [0, 0, 1, 1], [], []>} : vector<8x64xf32>, vector<64x128xf32>, vector<8x128xf32> -> vector<8x128xf32>
    %c64 = arith.constant 64 : index
    %c0_3 = arith.constant 0 : index
    %3 = vector.load %arg3[%c64, %c0_3] : memref<240x128xf32, #tpu.memory_space<vmem>>, vector<32x128xf32>
    %c0_4 = arith.constant 0 : index
    %c0_5 = arith.constant 0 : index
    %4 = vector.load %arg2[%c0_4, %c0_5] : memref<8x32xf32, #tpu.memory_space<vmem>>, vector<8x32xf32>
    %cst_6 = arith.constant dense<0.000000e+00> : vector<8x128xf32>
    %5 = tpu.matmul %4, %3, %cst_6 {dimension_numbers = #tpu.dot_dimension_numbers<[1], [0], [0], [1], [0, 0, 1, 1], [], []>} : vector<8x32xf32>, vector<32x128xf32>, vector<8x128xf32> -> vector<8x128xf32>
    %6 = arith.addf %2, %5 : vector<8x128xf32>
    %c96 = arith.constant 96 : index
    %c0_7 = arith.constant 0 : index
    %7 = vector.load %arg3[%c96, %c0_7] : memref<240x128xf32, #tpu.memory_space<vmem>>, vector<1x128xf32>
    %8 = vector.broadcast %7 : vector<1x128xf32> to vector<8x128xf32>
    %9 = arith.addf %6, %8 : vector<8x128xf32>
    %cst_8 = arith.constant 5.000000e-01 : f32
    %10 = vector.broadcast %cst_8 : f32 to vector<8x128xf32>
    %11 = arith.mulf %10, %9 : vector<8x128xf32>
    %cst_9 = arith.constant 0.707106769 : f32
    %12 = vector.broadcast %cst_9 : f32 to vector<8x128xf32>
    %13 = arith.mulf %9, %12 : vector<8x128xf32>
    %14 = math.erf %13 : vector<8x128xf32>
    %cst_10 = arith.constant 1.000000e+00 : f32
    %15 = vector.broadcast %cst_10 : f32 to vector<8x128xf32>
    %16 = arith.addf %15, %14 : vector<8x128xf32>
    %17 = arith.mulf %11, %16 : vector<8x128xf32>
    %c104 = arith.constant 104 : index
    %c0_11 = arith.constant 0 : index
    %18 = vector.load %arg3[%c104, %c0_11] : memref<240x128xf32, #tpu.memory_space<vmem>>, vector<128x128xf32>
    %cst_12 = arith.constant dense<0.000000e+00> : vector<8x128xf32>
    %19 = tpu.matmul %17, %18, %cst_12 {dimension_numbers = #tpu.dot_dimension_numbers<[1], [0], [0], [1], [0, 0, 1, 1], [], []>} : vector<8x128xf32>, vector<128x128xf32>, vector<8x128xf32> -> vector<8x128xf32>
    %c232 = arith.constant 232 : index
    %c0_13 = arith.constant 0 : index
    %20 = vector.load %arg3[%c232, %c0_13] : memref<240x128xf32, #tpu.memory_space<vmem>>, vector<1x128xf32>
    %21 = vector.broadcast %20 : vector<1x128xf32> to vector<8x128xf32>
    %22 = arith.addf %19, %21 : vector<8x128xf32>
    %c0_14 = arith.constant 0 : index
    %c0_15 = arith.constant 0 : index
    %23 = vector.load %arg4[%c0_14, %c0_15] : memref<8x128xf32, #tpu.memory_space<vmem>>, vector<8x128xf32>
    tpu.vector_store %arg4[%c0_14, %c0_15], %22 {strides = array<i32>} : memref<8x128xf32, #tpu.memory_space<vmem>>, vector<8x128xf32>,
    return
  }
  func.func @transform_0(%arg0: i32) -> (i32, i32) {
    %c0_i32 = arith.constant 0 : i32
    %c0_i32_0 = arith.constant 0 : i32
    return %arg0, %c0_i32 : i32, i32
  }
  func.func @transform_1(%arg0: i32) -> (i32, i32) {
    %c0_i32 = arith.constant 0 : i32
    %c0_i32_0 = arith.constant 0 : i32
    return %arg0, %c0_i32 : i32, i32
  }
  func.func @transform_2(%arg0: i32) -> (i32, i32) {
    %c0_i32 = arith.constant 0 : i32
    %c0_i32_0 = arith.constant 0 : i32
    %c0_i32_1 = arith.constant 0 : i32
    return %c0_i32, %c0_i32_0 : i32, i32
  }
  func.func @transform_3(%arg0: i32) -> (i32, i32) {
    %c0_i32 = arith.constant 0 : i32
    %c0_i32_0 = arith.constant 0 : i32
    return %arg0, %c0_i32 : i32, i32
  }
}

</mosaic_0001>

<bundles_post_ra>
// kernel: tpu_custom_call.1
= control target key start
LH: loop header
LB: loop body
LE: loop exit
PB: predicated region body
PF: predicated region fallthrough
CT: control target
= control target key end

     0   :  { %8 = vsyncpa [#allocation3], 0  ;;  %s377_s0 = inlined_call_operand.hbm [shape: f32[8,64], index: 0, kind: input, shape index: {}]   ;;  %s378_s1 = inlined_call_operand.hbm [shape: f32[8,32], index: 1, kind: input, shape index: {}]   ;;  %s379_s2 = inlined_call_operand.hbm [shape: f32[240,128], index: 2, kind: input, shape index: {}]   ;;  %s380_s3 = inlined_call_operand.hbm [shape: f32[8,128], index: 3, kind: output, shape index: {}]  }
   0x1   :  { %9 = vsyncpa [#allocation6], 0  ;;  %s27_s14 = sshll.u32 %s378_s1, 4  ;;  %s28_s14 = int_to_ptr.hbm [resolvable:$true] %s27_s14 }
   0x2   :  { %10 = vsyncpa [#allocation4], 0  ;;  %s339_s15 = smov [#allocation5]   ;;  %s16_s19 = sshll.u32 %s377_s0, 4  ;;  %s17_s19 = int_to_ptr.hbm [resolvable:$true] %s16_s19 }
   0x3   :  { %s29_s16 = sshll.u32 %s339_s15, 4  ;;  %s340_s20 = smov [#allocation2]   ;;  %s30_s16 = int_to_ptr.vmem [resolvable:$true] %s29_s16 }
   0x4   :  { %32 = dma.hbm_to_vmem [thread:$0]  %s28_s14, 128, %s30_s16, [#allocation6]  }
   0x5   :  { %s18_s21 = sshll.u32 %s340_s20, 4  ;;  %s37_s24 = sshll.u32 %s379_s2, 4  ;;  %s19_s21 = int_to_ptr.vmem [resolvable:$true] %s18_s21  ;;  %s38_s24 = int_to_ptr.hbm [resolvable:$true] %s37_s24 }
   0x6   :  { %21 = dma.hbm_to_vmem [thread:$0]  %s17_s19, 128, %s19_s21, [#allocation3]  }
   0x7   :  { %s341_s1 = smov [#allocation7]   ;;  %s342_s26 = smov 128  }
   0x8   :  { %s39_s25 = sshll.u32 %s341_s1, 4  ;;  %s343_s27 = smov 8   ;;  %s40_s25 = int_to_ptr.vmem [resolvable:$true] %s39_s25 }
   0x9   :  { %45 = dma.hbm_to_vmem [thread:$0]  %s38_s24, 3840, %s40_s25, [#allocation6], %s342_s26, %s342_s26, %s343_s27  }
   0xa   :  { %333 = dma.done.wait [#allocation3], 128  }
   0xb   :  { %334 = vsyncadd [#allocation3], 4294967168 }
   0xc   :  { %335 = dma.done.wait [#allocation6], 3968  }
   0xd   :  { %336 = vsyncadd [#allocation6], 4294963328  ;;  %v65_v0 = vld [vmem:[#allocation7 + $0x38] sm:$0xff]  ;;  %v64_v1 = vld [vmem:[#allocation7 + $0x30] sm:$0xff]  ;;  %vm72_vm0 = vcmask 261120   ;;  %vm96_vm1 = vcmask 523264  }
   0xe   :  { %108 = vmatpush.msra.mxu1 %v65_v0  ;;  %v70_v2 = vld [vmem:[#allocation7 + $0x58] sm:$0xff]  ;;  %v63_v3 = vld [vmem:[#allocation7 + $0x28] sm:$0xff]  ;;  %v69_v4 = vld [vmem:[#allocation7 + $0x50] sm:$0xff]  ;;  %s344_s0 = smov [#allocation8]   ;;  %s213_s30 = sshll.u32 %s380_s3, 4  ;;  %s214_s30 = int_to_ptr.hbm [resolvable:$true] %s213_s30 }
   0xf   :  { %88 = vmatpush.msra.mxu0 %v70_v2  ;;  %v68_v5 = vld [vmem:[#allocation7 + $0x48] sm:$0xff]  ;;  %v62_v6 = vld [vmem:[#allocation7 + $0x20] sm:$0xff]  ;;  %v61_v8 = vld [vmem:[#allocation7 + $0x18] sm:$0xff]  ;;  %s211_s2 = sshll.u32 %s344_s0, 4  ;;  %s212_s2 = int_to_ptr.vmem [resolvable:$true] %s211_s2 }
  0x10   :  { %109 = vmatpush.msra.mxu1 %v64_v1  ;;  %v67_v7 = vld [vmem:[#allocation7 + $0x40] sm:$0xff]  ;;  %v71_v9 = vld [vmem:[#allocation5] sm:$0xff]  ;;  %v60_v10 = vld [vmem:[#allocation7 + $0x10] sm:$0xff] }
  0x11   :  { %89 = vmatpush.msra.mxu0 %v69_v4  ;;  %v59_v11 = vld [vmem:[#allocation7 + $0x8] sm:$0xff]  ;;  %v58_v12 = vld [vmem:[#allocation7] sm:$0xff]  ;;  %v66_v13 = vld [vmem:[#allocation2] sm:$0xff] }
  0x12   :  { %110 = vmatpush.msra.mxu1 %v63_v3  ;;  %v182_v14 = vld [vmem:[#allocation7 + $0xe0] sm:$0xff]  ;;  %v181_v15 = vld [vmem:[#allocation7 + $0xd8] sm:$0xff]  ;;  %v180_v16 = vld [vmem:[#allocation7 + $0xd0] sm:$0xff] }
  0x13   :  { %90 = vmatpush.msra.mxu0 %v68_v5  ;;  %185 = vmatpush.msra.mxu2 %v182_v14  ;;  %v179_v17 = vld [vmem:[#allocation7 + $0xc8] sm:$0xff]  ;;  %v178_v18 = vld [vmem:[#allocation7 + $0xc0] sm:$0xff]  ;;  %v177_v19 = vld [vmem:[#allocation7 + $0xb8] sm:$0xff] }
  0x14   :  { %111 = vmatpush.msra.mxu1 %v62_v6  ;;  %v176_v20 = vld [vmem:[#allocation7 + $0xb0] sm:$0xff]  ;;  %v175_v21 = vld [vmem:[#allocation7 + $0xa8] sm:$0xff]  ;;  %v174_v22 = vld [vmem:[#allocation7 + $0xa0] sm:$0xff] }
  0x15   :  { %91 = vmatpush.msra.mxu0 %v67_v7  ;;  %186 = vmatpush.msra.mxu2 %v181_v15  ;;  %v173_v23 = vld [vmem:[#allocation7 + $0x98] sm:$0xff]  ;;  %v172_v24 = vld [vmem:[#allocation7 + $0x90] sm:$0xff]  ;;  %v171_v25 = vld [vmem:[#allocation7 + $0x88] sm:$0xff] }
  0x16   :  { %112 = vmatpush.msra.mxu1 %v61_v8  ;;  %224 = vmatmul.msk.f32.vlgmr.msra.gmra.mxu0 %vm72_vm0, %v71_v9  ;;  %v233_v27 = vld [vmem:[#allocation7 + $0x60] ss:$0 sm:$0xff]  ;;  %v169_v31 = vld [vmem:[#allocation7 + $0x78] sm:$0xff]  ;;  %v168_v33 = vld [vmem:[#allocation7 + $0x70] sm:$0xff] }
  0x17   :  { %187 = vmatpush.msra.mxu2 %v180_v16  ;;  %v170_v28 = vld [vmem:[#allocation7 + $0x80] sm:$0xff]  ;;  %v167_v35 = vld [vmem:[#allocation7 + $0x68] sm:$0xff] }
  0x18   :  { %113 = vmatpush.msra.mxu1 %v60_v10  ;;  %v234_v10 = vld [vmem:[#allocation7 + $0xe8] ss:$0 sm:$0xff] }
  0x19   :  { %188 = vmatpush.msra.mxu2 %v179_v17 }
  0x1a   :  { %114 = vmatpush.msra.mxu1 %v59_v11 }
  0x1b   :  { %189 = vmatpush.msra.mxu2 %v178_v18 }
  0x1c   :  { %115 = vmatpush.msra.mxu1 %v58_v12 }
  0x1d   :  { %225 = vmatmul.msk.f32.vlgmr.msra.gmra.mxu1 %vm96_vm1, %v66_v13  ;;  %190 = vmatpush.msra.mxu2 %v177_v19 }
  0x1f   :  { %191 = vmatpush.msra.mxu2 %v176_v20 }
  0x21   :  { %192 = vmatpush.msra.mxu2 %v175_v21 }
  0x23   :  { %193 = vmatpush.msra.mxu2 %v174_v22 }
  0x25   :  { %194 = vmatpush.msra.mxu2 %v173_v23 }
  0x27   :  { %195 = vmatpush.msra.mxu2 %v172_v24 }
  0x29   :  { %196 = vmatpush.msra.mxu2 %v171_v25 }
  0x2b   :  { %197 = vmatpush.msra.mxu2 %v170_v28 }
  0x2d   :  { %198 = vmatpush.msra.mxu2 %v169_v31 }
  0x2f   :  { %199 = vmatpush.msra.mxu2 %v168_v33 }
  0x31   :  { %200 = vmatpush.msra.mxu2 %v167_v35 }
  0x93   :  { %v93_v26 = vpop.f32.mrf.mxu0 }
  0x9a   :  { %v117_v29 = vpop.f32.mrf.mxu1 }
  0x9b   :  { %v118_v30 = vadd.f32 %v117_v29, %v93_v26 }
  0x9d   :  { %v122_v32 = vadd.f32 %v233_v27, %v118_v30 }
  0x9f   :  { %v124_v34 = vmul.f32 0.70710677, %v122_v32  ;;  %v123_v7 = vmul.f32 0.5, %v122_v32 }
  0xa1   :  { %v125_v36 = vmul.f32 %v124_v34, %v124_v34 }
  0xa3   :  { %v126_v37 = vmin.f32 %v125_v36, 16.0 }
  0xa5   :  { %v127_v38 = vmul.f32 2.1237322e-06, %v126_v37  ;;  %v138_v39 = vmul.f32 3.8918573e-05, %v126_v37 }
  0xa7   :  { %v128_v40 = vadd.f32 0.00028619796, %v127_v38  ;;  %v139_v41 = vadd.f32 0.001143296, %v138_v39 }
  0xa9   :  { %v129_v42 = vmul.f32 %v128_v40, %v126_v37  ;;  %v140_v43 = vmul.f32 %v139_v41, %v126_v37 }
  0xab   :  { %v141_v44 = vadd.f32 0.014752088, %v140_v43  ;;  %v130_v45 = vadd.f32 0.0036580483, %v129_v42 }
  0xad   :  { %v142_v46 = vmul.f32 %v141_v44, %v126_v37  ;;  %v131_v48 = vmul.f32 %v130_v45, %v126_v37 }
  0xaf   :  { %v143_v47 = vadd.f32 0.112945676, %v142_v46  ;;  %v132_v51 = vadd.f32 0.05243302, %v131_v48 }
  0xb1   :  { %v144_v49 = vmul.f32 %v143_v47, %v126_v37  ;;  %v133_v54 = vmul.f32 %v132_v51, %v126_v37 }
  0xb3   :  { %v145_v50 = vadd.f32 0.4994258, %v144_v49  ;;  %v134_v55 = vadd.f32 0.18741608, %v133_v54 }
  0xb5   :  { %v146_v52 = vmul.f32 %v145_v50, %v126_v37  ;;  %v135_v57 = vmul.f32 %v134_v55, %v126_v37 }
  0xb7   :  { %v147_v53 = vadd.f32 1.0, %v146_v52  ;;  %v136_v61 = vadd.f32 1.1283791, %v135_v57 }
  0xb9   :  { %235 = vrcp.f32 %v147_v53  ;;  %v159_v60 = vand.u32 2147483648, %v147_v53  ;;  %v157_v63 = vand.u32 2147483647, %v147_v53  ;;  %vm153_vm3 = vweird.f32 %v147_v53 }
  0xba   :  { %v137_v2 = vmul.f32 %v136_v61, %v124_v34 }
  0xbb   :  { %v160_v1 = vor.u32 1.1754944e-38, %v159_v60  ;;  %vm158_vm5 = vcmp.eq.f32.partialorder %v157_v63, 8.507059e+37 }
  0xbf   :  { %v236_v56 = vpop.eup %235 }
  0xc0   :  { %v149_v58 = vmul.f32 %v236_v56, %v147_v53  ;;  %vm154_vm2 = vweird.f32 %v236_v56 }
  0xc1   :  { %vm155_vm4 = vmor %vm153_vm3, %vm154_vm2 }
  0xc2   :  { %v150_v59 = vsub.f32 1.0, %v149_v58 }
  0xc4   :  { %v151_v62 = vmul.f32 %v236_v56, %v150_v59 }
  0xc6   :  { %v152_v0 = vadd.f32 %v236_v56, %v151_v62 }
  0xc8   :  { %v156_v3 = vsel %vm155_vm4, %v236_v56, %v152_v0 }
  0xc9   :  { %v161_v4 = vsel %vm158_vm5, %v160_v1, %v156_v3 }
  0xca   :  { %v162_v5 = vmul.f32 %v161_v4, %v137_v2 }
  0xcc   :  { %v226_v6 = vclamps-f32 %v162_v5, 1.0 }
  0xce   :  { %v165_v8 = vadd.f32 1.0, %v226_v6 }
  0xd0   :  { %v166_v9 = vmul.f32 %v165_v8, %v123_v7 }
  0xd2   :  { %201 = vmatmul.f32.vlgmr.msra.gmra.mxu2 %v166_v9 }
 0x155   :  { %v202_v11 = vpop.f32.mrf.mxu2 }
 0x156   :  { %v203_v12 = vadd.f32 %v234_v10, %v202_v11 }
 0x158   :  { %205 = vst [vmem:[#allocation8] sm:$0xff] %v203_v12 }
 0x159   :  { %216 = dma.vmem_to_hbm [thread:$0]  %s212_s2, 128, %s214_s30, [#allocation4]  }
 0x15a   :  { %337 = dma.done.wait [#allocation4], 128  }
 0x15b   :  { %338 = vsyncadd [#allocation4], 4294967168 }
 0x15c   :  { %221 = vsyncpa [#allocation3], 1 }
 0x15d   :  { %222 = vsyncpa [#allocation6], 1 }
 0x15e   :  { %223 = vsyncpa [#allocation4], 1 }

</bundles_post_ra>
